<compile_context>
chip_gen: v7x
topology: tpu7x:2x2x1
jax: 0.10.0
libtpu: 0.0.40
codegen_flags: <defaults>
</compile_context>

<pallas_src>
import functools

import jax
import jax.numpy as jnp
from jax.experimental import pallas as pl
from jax.experimental.pallas import tpu as pltpu


# ---------------------------------------------------------------------------
# Fused Pallas kernel: all GCN layers + (pre-folded) output linear, one graph
# per grid step.
# ---------------------------------------------------------------------------
def _fused_gcn_kernel(x_ref, a_ref, w_ref, o_ref, *, layer_meta):
    """x_ref: [N, F_in] features, a_ref: [N, N] dense adjacency,
    w_ref: [rows, 128] packed weight/bias slab, o_ref: [N, out_channels].

    layer_meta: static tuple of (w_row_off, f_in, f_out, b_row_off); the last
    entry carries the last GCN layer pre-folded with the output linear.
    """
    a = a_ref[...]
    h = x_ref[...]
    n_layers = len(layer_meta)
    for i, (w_off, f_in, f_out, b_off) in enumerate(layer_meta):
        w = w_ref[w_off:w_off + f_in, 0:f_out]          # static slice of the slab
        b = w_ref[b_off:b_off + 1, 0:f_out]             # [1, f_out], broadcasts
        if f_in <= f_out:
            # Push A through the narrower (input) feature width first.
            h = jnp.dot(
                jnp.dot(a, h, preferred_element_type=jnp.float32),
                w,
                preferred_element_type=jnp.float32,
            ) + b
        else:
            # Project down first, then the N^2 matmul runs over f_out lanes.
            h = jnp.dot(
                a,
                jnp.dot(h, w, preferred_element_type=jnp.float32),
                preferred_element_type=jnp.float32,
            ) + b
        if i != n_layers - 1:
            h = jnp.maximum(h, 0.0)
        # dropout(p, training=False) -> identity (inference semantics)
    o_ref[...] = h.astype(o_ref.dtype)


# ---------------------------------------------------------------------------
# One-time parameter packing (runs eagerly, OUTSIDE jit / the per-call path)
# ---------------------------------------------------------------------------
def _round_up(x, m):
    return (x + m - 1) // m * m


def pack_params(params):
    """Fold the last GCN layer into the output linear and pack everything into
    a single f32 [rows, 128] slab with static, sublane-aligned row offsets."""
    gcn = params["gcn"]
    w_lin_t, b_lin = params["lin"]

    w_last, b_last = gcn[-1]
    w_folded = w_last @ w_lin_t              # [hidden, out_channels]
    b_folded = b_last @ w_lin_t + b_lin      # [out_channels]

    mats = [w for (w, _) in gcn[:-1]] + [w_folded]
    vecs = [b for (_, b) in gcn[:-1]] + [b_folded]

    # Static layout: weights first (each start aligned to 8 sublanes), then one
    # row per bias.
    row = 0
    w_offs = []
    for w in mats:
        row = _round_up(row, 8)
        w_offs.append(row)
        row += int(w.shape[0])
    b_offs = []
    for _ in vecs:
        b_offs.append(row)
        row += 1
    total_rows = _round_up(row, 8)

    slab = jnp.zeros((total_rows, 128), jnp.float32)
    for w, off in zip(mats, w_offs):
        slab = slab.at[off:off + w.shape[0], :w.shape[1]].set(w)
    for b, off in zip(vecs, b_offs):
        slab = slab.at[off, :b.shape[0]].set(b)

    meta = tuple(
        (w_offs[i], int(mats[i].shape[0]), int(mats[i].shape[1]), b_offs[i])
        for i in range(len(mats))
    )
    return {
        "slab": jax.device_put(slab),
        "meta": meta,
        "out_channels": int(w_lin_t.shape[1]),
    }


# ---------------------------------------------------------------------------
# Forward wrapper (factory closes over the static packed layout)
# ---------------------------------------------------------------------------
def make_two_inputs_gcn_forward(packed):
    slab = packed["slab"]
    meta = packed["meta"]
    out_ch = packed["out_channels"]
    kernel = functools.partial(_fused_gcn_kernel, layer_meta=meta)

    @jax.jit
    def _fwd(x, adj, slab_arr):
        single = (x.ndim == 2)
        if single:
            x, adj = x[None], adj[None]
        batch, n, f_in = x.shape
        out = pl.pallas_call(
            kernel,
            out_shape=jax.ShapeDtypeStruct((batch, n, out_ch), jnp.float32),
            grid=(batch,),
            in_specs=[
                pl.BlockSpec((None, n, f_in), lambda b: (b, 0, 0)),
                pl.BlockSpec((None, n, n), lambda b: (b, 0, 0)),
                # Same block every step -> weight slab stays VMEM-resident.
                pl.BlockSpec(slab_arr.shape, lambda b: (0, 0)),
            ],
            out_specs=pl.BlockSpec((None, n, out_ch), lambda b: (b, 0, 0)),
            compiler_params=pltpu.CompilerParams(
                dimension_semantics=("parallel",)),
        )(x, adj, slab_arr)
        return out[0] if single else out

    def forward(input1, in_feat1):
        """input1: [N, F] or [B, N, F]; in_feat1: [N, N] or [B, N, N]."""
        return _fwd(input1, in_feat1, slab)

    return forward


# ---------------------------------------------------------------------------
# Model: parameter construction + plain-JAX reference
# ---------------------------------------------------------------------------
def init_two_inputs_gcn_params(key, in_channels, hidden_channels, out_channels, num_layers):
    """Deterministic synthetic parameters matching the module's shapes.
    GCN backbone output dim is hard-coded to 128 in TwoInputsGCN.__init__."""
    dims = [in_channels] + [hidden_channels] * (num_layers - 1) + [128]
    params = {"gcn": [], "lin": None}
    keys = jax.random.split(key, num_layers + 1)
    for layer in range(num_layers):
        f_in, f_out = dims[layer], dims[layer + 1]
        kw, kb = jax.random.split(keys[layer])
        w = jax.random.normal(kw, (f_in, f_out), jnp.float32) * (1.0 / jnp.sqrt(f_in))
        b = jax.random.normal(kb, (f_out,), jnp.float32) * 0.01
        params["gcn"].append((w, b))
    kw, kb = jax.random.split(keys[-1])
    # nn.Linear(128, out_channels): weight [out, 128]; store transposed [128, out].
    w_lin_t = jax.random.normal(kw, (128, out_channels), jnp.float32) * (1.0 / jnp.sqrt(128.0))
    b_lin = jax.random.normal(kb, (out_channels,), jnp.float32) * 0.01
    params["lin"] = (w_lin_t, b_lin)
    return params


def two_inputs_gcn_reference(params, input1, in_feat1):
    """Plain-JAX reference with the original (unfused, unfolded) op order."""
    x = input1
    adj = in_feat1
    n_layers = len(params["gcn"])
    for i, (w, b) in enumerate(params["gcn"]):
        x = adj @ (x @ w) + b
        if i != n_layers - 1:
            x = jnp.maximum(x, 0.0)
    w_lin_t, b_lin = params["lin"]
    return x @ w_lin_t + b_lin


# ---------------------------------------------------------------------------
# Main
# ---------------------------------------------------------------------------
if __name__ == "__main__":
    N = 128            # number of graph nodes
    IN_CHANNELS = 16
    HIDDEN = 32
    OUT_CHANNELS = 8
    NUM_LAYERS = 3
    BATCH = 4

    key = jax.random.PRNGKey(0)
    k_params, k_x, k_adj = jax.random.split(key, 3)

    params = init_two_inputs_gcn_params(k_params, IN_CHANNELS, HIDDEN, OUT_CHANNELS, NUM_LAYERS)
    packed = pack_params(params)                 # one-time fold + slab packing
    forward = make_two_inputs_gcn_forward(packed)

    # ---- single graph (module's native calling convention) ----
    input1 = jax.random.normal(k_x, (N, IN_CHANNELS), jnp.float32)           # node features
    adj_raw = (jax.random.uniform(k_adj, (N, N)) < 0.05).astype(jnp.float32)  # GCNConv(normalize=False)
    in_feat1 = jnp.maximum(adj_raw, adj_raw.T)

    out = jax.block_until_ready(forward(input1, in_feat1))
    ref = two_inputs_gcn_reference(params, input1, in_feat1)
    assert out.shape == (N, OUT_CHANNELS), out.shape
    assert jnp.allclose(out, ref, rtol=1e-4, atol=1e-3), "Pallas output mismatch vs reference (single)"

    # ---- batched graphs: grid over B engages pipelining / v7x dual-TC ----
    kxs = jax.random.split(k_x, BATCH)
    kas = jax.random.split(k_adj, BATCH)
    xb = jnp.stack([jax.random.normal(k, (N, IN_CHANNELS), jnp.float32) for k in kxs])
    adjs = []
    for k in kas:
        a = (jax.random.uniform(k, (N, N)) < 0.05).astype(jnp.float32)
        adjs.append(jnp.maximum(a, a.T))
    adjb = jnp.stack(adjs)

    outb = jax.block_until_ready(forward(xb, adjb))
    refb = jnp.stack([two_inputs_gcn_reference(params, xb[i], adjb[i]) for i in range(BATCH)])
    assert outb.shape == (BATCH, N, OUT_CHANNELS), outb.shape
    assert jnp.allclose(outb, refb, rtol=1e-4, atol=1e-3), "Pallas output mismatch vs reference (batched)"

    print("KERNEL_OK")
</pallas_src>

<mosaic_0001>
module attributes {stable_mosaic.version = 11 : i64} {
  func.func @_fused_gcn_kernel(%arg0: i32, %arg1: memref<1x128x16xf32, #tpu.memory_space<vmem>>, %arg2: memref<1x128x128xf32, #tpu.memory_space<vmem>>, %arg3: memref<88x128xf32, #tpu.memory_space<vmem>>, %arg4: memref<1x128x8xf32, #tpu.memory_space<vmem>>) attributes {dimension_semantics = [#tpu.dimension_semantics<parallel>], iteration_bounds = array<i64: 1>, scalar_prefetch = 0 : i64, scratch_operands = 0 : i64, tpu.core_type = #tpu.core_type<tc>, window_params = [{transform_indices = @transform_0, window_bounds = array<i64: 1, 128, 16>}, {transform_indices = @transform_1, window_bounds = array<i64: 1, 128, 128>}, {pipeline_mode = #tpu.pipeline_mode<synchronous>, transform_indices = @transform_2, window_bounds = array<i64: 88, 128>}, {transform_indices = @transform_3, window_bounds = array<i64: 1, 128, 8>}]} {
    %c0 = arith.constant 0 : index
    %c0_0 = arith.constant 0 : index
    %c0_1 = arith.constant 0 : index
    %0 = vector.load %arg2[%c0, %c0_0, %c0_1] : memref<1x128x128xf32, #tpu.memory_space<vmem>>, vector<1x128x128xf32>
    %1 = vector.shape_cast %0 : vector<1x128x128xf32> to vector<128x128xf32>
    %c0_2 = arith.constant 0 : index
    %c0_3 = arith.constant 0 : index
    %c0_4 = arith.constant 0 : index
    %2 = vector.load %arg1[%c0_2, %c0_3, %c0_4] : memref<1x128x16xf32, #tpu.memory_space<vmem>>, vector<1x128x16xf32>
    %3 = vector.shape_cast %2 : vector<1x128x16xf32> to vector<128x16xf32>
    %c0_5 = arith.constant 0 : index
    %c0_6 = arith.constant 0 : index
    %4 = vector.load %arg3[%c0_5, %c0_6] : memref<88x128xf32, #tpu.memory_space<vmem>>, vector<16x32xf32>
    %c80 = arith.constant 80 : index
    %c0_7 = arith.constant 0 : index
    %5 = vector.load %arg3[%c80, %c0_7] : memref<88x128xf32, #tpu.memory_space<vmem>>, vector<1x32xf32>
    %cst = arith.constant dense<0.000000e+00> : vector<128x16xf32>
    %6 = tpu.matmul %1, %3, %cst {dimension_numbers = #tpu.dot_dimension_numbers<[1], [0], [0], [1], [0, 0, 1, 1], [], []>} : vector<128x128xf32>, vector<128x16xf32>, vector<128x16xf32> -> vector<128x16xf32>
    %cst_8 = arith.constant dense<0.000000e+00> : vector<128x32xf32>
    %7 = tpu.matmul %6, %4, %cst_8 {dimension_numbers = #tpu.dot_dimension_numbers<[1], [0], [0], [1], [0, 0, 1, 1], [], []>} : vector<128x16xf32>, vector<16x32xf32>, vector<128x32xf32> -> vector<128x32xf32>
    %8 = vector.broadcast %5 : vector<1x32xf32> to vector<128x32xf32>
    %9 = arith.addf %7, %8 : vector<128x32xf32>
    %cst_9 = arith.constant 0.000000e+00 : f32
    %10 = vector.broadcast %cst_9 : f32 to vector<128x32xf32>
    %11 = arith.maximumf %9, %10 : vector<128x32xf32>
    %c16 = arith.constant 16 : index
    %c0_10 = arith.constant 0 : index
    %12 = vector.load %arg3[%c16, %c0_10] : memref<88x128xf32, #tpu.memory_space<vmem>>, vector<32x32xf32>
    %c81 = arith.constant 81 : index
    %c0_11 = arith.constant 0 : index
    %13 = vector.load %arg3[%c81, %c0_11] : memref<88x128xf32, #tpu.memory_space<vmem>>, vector<1x32xf32>
    %cst_12 = arith.constant dense<0.000000e+00> : vector<128x32xf32>
    %14 = tpu.matmul %1, %11, %cst_12 {dimension_numbers = #tpu.dot_dimension_numbers<[1], [0], [0], [1], [0, 0, 1, 1], [], []>} : vector<128x128xf32>, vector<128x32xf32>, vector<128x32xf32> -> vector<128x32xf32>
    %cst_13 = arith.constant dense<0.000000e+00> : vector<128x32xf32>
    %15 = tpu.matmul %14, %12, %cst_13 {dimension_numbers = #tpu.dot_dimension_numbers<[1], [0], [0], [1], [0, 0, 1, 1], [], []>} : vector<128x32xf32>, vector<32x32xf32>, vector<128x32xf32> -> vector<128x32xf32>
    %16 = vector.broadcast %13 : vector<1x32xf32> to vector<128x32xf32>
    %17 = arith.addf %15, %16 : vector<128x32xf32>
    %cst_14 = arith.constant 0.000000e+00 : f32
    %18 = vector.broadcast %cst_14 : f32 to vector<128x32xf32>
    %19 = arith.maximumf %17, %18 : vector<128x32xf32>
    %c48 = arith.constant 48 : index
    %c0_15 = arith.constant 0 : index
    %20 = vector.load %arg3[%c48, %c0_15] : memref<88x128xf32, #tpu.memory_space<vmem>>, vector<32x8xf32>
    %c82 = arith.constant 82 : index
    %c0_16 = arith.constant 0 : index
    %21 = vector.load %arg3[%c82, %c0_16] : memref<88x128xf32, #tpu.memory_space<vmem>>, vector<1x8xf32>
    %cst_17 = arith.constant dense<0.000000e+00> : vector<128x8xf32>
    %22 = tpu.matmul %19, %20, %cst_17 {dimension_numbers = #tpu.dot_dimension_numbers<[1], [0], [0], [1], [0, 0, 1, 1], [], []>} : vector<128x32xf32>, vector<32x8xf32>, vector<128x8xf32> -> vector<128x8xf32>
    %cst_18 = arith.constant dense<0.000000e+00> : vector<128x8xf32>
    %23 = tpu.matmul %1, %22, %cst_18 {dimension_numbers = #tpu.dot_dimension_numbers<[1], [0], [0], [1], [0, 0, 1, 1], [], []>} : vector<128x128xf32>, vector<128x8xf32>, vector<128x8xf32> -> vector<128x8xf32>
    %24 = vector.broadcast %21 : vector<1x8xf32> to vector<128x8xf32>
    %25 = arith.addf %23, %24 : vector<128x8xf32>
    %c0_19 = arith.constant 0 : index
    %c0_20 = arith.constant 0 : index
    %c0_21 = arith.constant 0 : index
    %26 = vector.load %arg4[%c0_19, %c0_20, %c0_21] : memref<1x128x8xf32, #tpu.memory_space<vmem>>, vector<1x128x8xf32>
    %27 = vector.shape_cast %26 : vector<1x128x8xf32> to vector<128x8xf32>
    %28 = vector.shape_cast %25 : vector<128x8xf32> to vector<1x128x8xf32>
    tpu.vector_store %arg4[%c0_19, %c0_20, %c0_21], %28 {strides = array<i32>} : memref<1x128x8xf32, #tpu.memory_space<vmem>>, vector<1x128x8xf32>,
    return
  }
  func.func @transform_0(%arg0: i32) -> (i32, i32, i32) {
    %c0_i32 = arith.constant 0 : i32
    %c0_i32_0 = arith.constant 0 : i32
    %c0_i32_1 = arith.constant 0 : i32
    return %arg0, %c0_i32, %c0_i32_0 : i32, i32, i32
  }
  func.func @transform_1(%arg0: i32) -> (i32, i32, i32) {
    %c0_i32 = arith.constant 0 : i32
    %c0_i32_0 = arith.constant 0 : i32
    %c0_i32_1 = arith.constant 0 : i32
    return %arg0, %c0_i32, %c0_i32_0 : i32, i32, i32
  }
  func.func @transform_2(%arg0: i32) -> (i32, i32) {
    %c0_i32 = arith.constant 0 : i32
    %c0_i32_0 = arith.constant 0 : i32
    %c0_i32_1 = arith.constant 0 : i32
    return %c0_i32, %c0_i32_0 : i32, i32
  }
  func.func @transform_3(%arg0: i32) -> (i32, i32, i32) {
    %c0_i32 = arith.constant 0 : i32
    %c0_i32_0 = arith.constant 0 : i32
    %c0_i32_1 = arith.constant 0 : i32
    return %arg0, %c0_i32, %c0_i32_0 : i32, i32, i32
  }
}

</mosaic_0001>

<bundles_post_ra>
// kernel: _fwd.1
= control target key start
LH: loop header
LB: loop body
LE: loop exit
PB: predicated region body
PF: predicated region fallthrough
CT: control target
= control target key end

     0   :  { %8 = vsyncpa [#allocation3], 0  ;;  %s1779_s12 = smov [#allocation2]   ;;  %s2120_s0 = inlined_call_operand.vmem [shape: f32[1,128,16], index: 0, kind: input, shape index: {}]   ;;  %s2121_s1 = inlined_call_operand.vmem [shape: f32[1,128,128], index: 1, kind: input, shape index: {}]   ;;  %s2122_s2 = inlined_call_operand.hbm [shape: f32[88,128], index: 2, kind: input, shape index: {}]   ;;  %s2123_s3 = inlined_call_operand.vmem [shape: f32[1,128,8], index: 3, kind: output, shape index: {}]  }
   0x1   :  { %s18_s13 = sshll.u32 %s1779_s12, 4  ;;  %s1755_s16 = scalar_lea.hbm %s2122_s2, 1408  ;;  %s19_s13 = int_to_ptr.vmem [resolvable:$true] %s18_s13 }
   0x2   :  { %p1756_p0 = scmp.ne.s32.totalorder %s2122_s2, %s1755_s16  ;;  %p1759_p1 = scmp.lt.u32.totalorder %s1755_s16, %s2122_s2 }
   0x4   :  { %p1761_p2 = pnand %p1759_p1, %p1756_p0 }
   0x6   :  { %1764 = shalt.err (!%p1761_p2)
}
   0x7   :  { %s1765_s21 = scalar_lea.vmem %s19_s13, 1408  ;;  %p1770_p4 = scmp.lt.s32.totalorder %s19_s13, %s19_s13 }
   0x8   :  { %p1766_p3 = scmp.ne.s32.totalorder %s19_s13, %s1765_s21  ;;  %p1771_p5 = scmp.lt.s32.totalorder %s1765_s21, %s1765_s21 }
   0xa   :  { %p1772_p6 = por %p1771_p5, %p1770_p4 }
   0xc   :  { %p1773_p7 = pnand %p1772_p6, %p1766_p3 }
   0xe   :  { %1776 = shalt.err (!%p1773_p7)
}
   0xf   :  { %s1780_s22 = smov 128   ;;  %s1781_s23 = smov 8  }
  0x10   :  { %24 = dma.hbm_to_vmem [thread:$0]  %s2122_s2, 1408, %s19_s13, [#allocation3], %s1780_s22, %s1780_s22, %s1781_s23  }
  0x11   :  { %1777 = dma.done.wait [#allocation3], 1408  }
  0x12   :  { %1778 = vsyncadd [#allocation3], 4294965888  ;;  %v44_v0 = vld [vmem:[%s2120_s0] sm:$0xff]  ;;  %v45_v1 = vld [vmem:[%s2120_s0 + $0x8] sm:$0xff]  ;;  %vm212_vm0 = vcmask 130048   ;;  %vm576_vm1 = vcmask 261120  }
  0x13   :  { %v46_v2 = vld [vmem:[%s2120_s0 + $0x10] sm:$0xff]  ;;  %v1620_v3 = vpack.c.bf16 %v45_v1, %v44_v0  ;;  %v47_v4 = vld [vmem:[%s2120_s0 + $0x18] sm:$0xff]  ;;  %v48_v6 = vld [vmem:[%s2120_s0 + $0x20] sm:$0xff]  ;;  %vm1133_vm2 = vcmask 64512  }
  0x14   :  { %v1624_v5 = vpack.c.bf16 %v47_v4, %v46_v2  ;;  %v49_v7 = vld [vmem:[%s2120_s0 + $0x28] sm:$0xff]  ;;  %v1835_v9 = vld [vmem:[%s2121_s1] sm:$0xff]  ;;  %v50_v10 = vld [vmem:[%s2120_s0 + $0x30] sm:$0xff] }
  0x15   :  { %1621 = vmatprep.subr.bf16.mxu0 %v1620_v3  ;;  %v1628_v8 = vpack.c.bf16 %v49_v7, %v48_v6  ;;  %v51_v11 = vld [vmem:[%s2120_s0 + $0x38] sm:$0xff]  ;;  %1392 = vmatprep.mubr.f32.mxu0 %v1835_v9  ;;  %v52_v13 = vld [vmem:[%s2120_s0 + $0x40] sm:$0xff]  ;;  %v53_v14 = vld [vmem:[%s2120_s0 + $0x48] sm:$0xff] }
  0x16   :  { %1623 = vmatpush3.bf16.msra.mxu0 %v1620_v3  ;;  %v1632_v12 = vpack.c.bf16 %v51_v11, %v50_v10  ;;  %v60_v15 = vld [vmem:[#allocation2] sm:$0xff]  ;;  %v61_v16 = vld [vmem:[#allocation2 + $0x8] sm:$0xff]  ;;  %v1636_v18 = vpack.c.bf16 %v53_v14, %v52_v13  ;;  %v54_v19 = vld [vmem:[%s2120_s0 + $0x50] sm:$0xff] }
  0x17   :  { %1625 = vmatprep.subr.bf16.mxu0 %v1624_v5  ;;  %v1652_v17 = vpack.c.bf16 %v61_v16, %v60_v15  ;;  %v55_v20 = vld [vmem:[%s2120_s0 + $0x58] sm:$0xff]  ;;  %v56_v22 = vld [vmem:[%s2120_s0 + $0x60] sm:$0xff]  ;;  %v57_v23 = vld [vmem:[%s2120_s0 + $0x68] sm:$0xff] }
  0x18   :  { %v1640_v21 = vpack.c.bf16 %v55_v20, %v54_v19  ;;  %v1644_v24 = vpack.c.bf16 %v57_v23, %v56_v22  ;;  %v58_v25 = vld [vmem:[%s2120_s0 + $0x70] sm:$0xff]  ;;  %v59_v26 = vld [vmem:[%s2120_s0 + $0x78] sm:$0xff]  ;;  %v1871_v28 = vld [vmem:[%s2121_s1 + $0x8] sm:$0xff] }
  0x19   :  { %1653 = vmatprep.subr.bf16.mxu1 %v1652_v17  ;;  %v1648_v27 = vpack.c.bf16 %v59_v26, %v58_v25  ;;  %v1876_v29 = vld [vmem:[%s2121_s1 + $0x10] sm:$0xff]  ;;  %v1883_v30 = vld [vmem:[%s2121_s1 + $0x18] sm:$0xff]  ;;  %v1888_v31 = vld [vmem:[%s2121_s1 + $0x20] sm:$0xff] }
  0x1a   :  { %1627 = vmatpush3.bf16.msra.mxu0 %v1624_v5  ;;  %1655 = vmatpush3.bf16.msra.mxu1 %v1652_v17  ;;  %v1895_v32 = vld [vmem:[%s2121_s1 + $0x28] sm:$0xff]  ;;  %v1900_v33 = vld [vmem:[%s2121_s1 + $0x30] sm:$0xff]  ;;  %v1907_v34 = vld [vmem:[%s2121_s1 + $0x38] sm:$0xff] }
  0x1b   :  { %1629 = vmatprep.subr.bf16.mxu0 %v1628_v8  ;;  %v1912_v35 = vld [vmem:[%s2121_s1 + $0x40] sm:$0xff]  ;;  %v1919_v36 = vld [vmem:[%s2121_s1 + $0x48] sm:$0xff]  ;;  %v1924_v37 = vld [vmem:[%s2121_s1 + $0x50] sm:$0xff] }
  0x1c   :  { %v1931_v38 = vld [vmem:[%s2121_s1 + $0x58] sm:$0xff]  ;;  %v1936_v39 = vld [vmem:[%s2121_s1 + $0x60] sm:$0xff]  ;;  %v1943_v40 = vld [vmem:[%s2121_s1 + $0x68] sm:$0xff] }
  0x1d   :  { %v1948_v41 = vld [vmem:[%s2121_s1 + $0x70] sm:$0xff]  ;;  %v1955_v42 = vld [vmem:[%s2121_s1 + $0x78] sm:$0xff]  ;;  %v424_v61 = vld [vmem:[#allocation2 + $0x20] sm:$0xff] }
  0x1e   :  { %1631 = vmatpush3.bf16.msra.mxu0 %v1628_v8  ;;  %v422_v59 = vld [vmem:[#allocation2 + $0x10] sm:$0xff]  ;;  %v423_v60 = vld [vmem:[#allocation2 + $0x18] sm:$0xff]  ;;  %v425_v63 = vld [vmem:[#allocation2 + $0x28] sm:$0xff] }
  0x1f   :  { %1633 = vmatprep.subr.bf16.mxu0 %v1632_v12  ;;  %v1688_v62 = vpack.c.bf16 %v423_v60, %v422_v59  ;;  %v1692_v0 = vpack.c.bf16 %v425_v63, %v424_v61  ;;  %v1975_v1 = vld [vmem:[#allocation2 + $0x50] ss:$0 sm:$0xff] }
  0x22   :  { %1635 = vmatpush3.bf16.msra.mxu0 %v1632_v12 }
  0x23   :  { %1637 = vmatprep.subr.bf16.mxu0 %v1636_v18 }
  0x26   :  { %1639 = vmatpush3.bf16.msra.mxu0 %v1636_v18 }
  0x27   :  { %1641 = vmatprep.subr.bf16.mxu0 %v1640_v21 }
  0x2a   :  { %1643 = vmatpush3.bf16.msra.mxu0 %v1640_v21 }
  0x2b   :  { %1645 = vmatprep.subr.bf16.mxu0 %v1644_v24 }
  0x2e   :  { %1647 = vmatpush3.bf16.msra.mxu0 %v1644_v24 }
  0x2f   :  { %1649 = vmatprep.subr.bf16.mxu0 %v1648_v27 }
  0x32   :  { %1651 = vmatpush3.bf16.msra.mxu0 %v1648_v27 }
  0x33   :  { %1689 = vmatprep.subr.bf16.mxu0 %v1688_v62 }
  0x35   :  { %1393 = vmatmul.mubr.f32.vlgmr.msra.gmra.mrb[0].mxu0 %v1871_v28 }
  0x36   :  { %1395 = vmatprep.mubr.f32.mxu0 %v1876_v29  ;;  %1691 = vmatpush3.bf16.msra.mxu0 %v1688_v62 }
  0x37   :  { %1693 = vmatprep.subr.bf16.mxu0 %v1692_v0 }
  0x39   :  { %1396 = vmatmul.mubr.f32.gmra.mrb[2].mxu0 %v1883_v30 }
  0x3a   :  { %1398 = vmatprep.mubr.f32.mxu0 %v1888_v31  ;;  %1695 = vmatpush3.bf16.msra.mxu0 %v1692_v0 }
  0x3d   :  { %1399 = vmatmul.mubr.f32.gmra.mrb[4].mxu0 %v1895_v32 }
  0x3e   :  { %1401 = vmatprep.mubr.f32.mxu0 %v1900_v33 }
  0x41   :  { %1402 = vmatmul.mubr.f32.gmra.mrb[6].mxu0 %v1907_v34 }
  0x42   :  { %1404 = vmatprep.mubr.f32.mxu0 %v1912_v35 }
  0x45   :  { %1405 = vmatmul.mubr.f32.gmra.mrb[8].mxu0 %v1919_v36 }
  0x46   :  { %1407 = vmatprep.mubr.f32.mxu0 %v1924_v37 }
  0x49   :  { %1408 = vmatmul.mubr.f32.gmra.mrb[10].mxu0 %v1931_v38 }
  0x4a   :  { %1410 = vmatprep.mubr.f32.mxu0 %v1936_v39 }
  0x4d   :  { %1411 = vmatmul.mubr.f32.gmra.mrb[12].mxu0 %v1943_v40 }
  0x4e   :  { %1413 = vmatprep.mubr.f32.mxu0 %v1948_v41 }
  0x51   :  { %1414 = vmatmul.mubr.f32.gmra.mrb[14].mxu0 %v1955_v42 }
 0x108   :  { %v1394_v43 = vpop.f32.mrb[0].mxu0 }
 0x109   :  { %v129_v44 = vpop.f32.mrb[1].mxu0 }
 0x10a   :  { %1420 = vmatprep.mubr.msk.f32.mxu1 %vm212_vm0, %v129_v44 }
 0x10b   :  { %1421 = vmatmul.mubr.msk.f32.vlgmr.msra.gmra.mrb[0].mxu1 %vm212_vm0, %v1394_v43 }
 0x10c   :  { %v1397_v45 = vpop.f32.mrb[2].mxu0 }
 0x10d   :  { %v139_v46 = vpop.f32.mrb[3].mxu0 }
 0x10e   :  { %1423 = vmatprep.mubr.msk.f32.mxu1 %vm212_vm0, %v139_v46 }
 0x10f   :  { %1424 = vmatmul.mubr.msk.f32.gmra.mrb[2].mxu1 %vm212_vm0, %v1397_v45 }
 0x110   :  { %v1400_v47 = vpop.f32.mrb[4].mxu0 }
 0x111   :  { %v149_v48 = vpop.f32.mrb[5].mxu0 }
 0x112   :  { %1426 = vmatprep.mubr.msk.f32.mxu1 %vm212_vm0, %v149_v48 }
 0x113   :  { %1427 = vmatmul.mubr.msk.f32.gmra.mrb[4].mxu1 %vm212_vm0, %v1400_v47 }
 0x114   :  { %v1403_v49 = vpop.f32.mrb[6].mxu0 }
 0x115   :  { %v159_v50 = vpop.f32.mrb[7].mxu0 }
 0x116   :  { %1429 = vmatprep.mubr.msk.f32.mxu1 %vm212_vm0, %v159_v50 }
 0x117   :  { %1430 = vmatmul.mubr.msk.f32.gmra.mrb[6].mxu1 %vm212_vm0, %v1403_v49 }
 0x118   :  { %v1406_v51 = vpop.f32.mrb[8].mxu0 }
 0x119   :  { %v169_v52 = vpop.f32.mrb[9].mxu0 }
 0x11a   :  { %1432 = vmatprep.mubr.msk.f32.mxu1 %vm212_vm0, %v169_v52 }
 0x11b   :  { %1433 = vmatmul.mubr.msk.f32.gmra.mrb[8].mxu1 %vm212_vm0, %v1406_v51 }
 0x11c   :  { %v1409_v53 = vpop.f32.mrb[10].mxu0 }
 0x11d   :  { %v179_v54 = vpop.f32.mrb[11].mxu0 }
 0x11e   :  { %1435 = vmatprep.mubr.msk.f32.mxu1 %vm212_vm0, %v179_v54 }
 0x11f   :  { %1436 = vmatmul.mubr.msk.f32.gmra.mrb[10].mxu1 %vm212_vm0, %v1409_v53 }
 0x120   :  { %v1412_v55 = vpop.f32.mrb[12].mxu0 }
 0x121   :  { %v189_v56 = vpop.f32.mrb[13].mxu0 }
 0x122   :  { %1438 = vmatprep.mubr.msk.f32.mxu1 %vm212_vm0, %v189_v56 }
 0x123   :  { %1439 = vmatmul.mubr.msk.f32.gmra.mrb[12].mxu1 %vm212_vm0, %v1412_v55 }
 0x124   :  { %v1415_v57 = vpop.f32.mrb[14].mxu0 }
 0x125   :  { %v199_v58 = vpop.f32.mrb[15].mxu0 }
 0x126   :  { %1441 = vmatprep.mubr.msk.f32.mxu1 %vm212_vm0, %v199_v58 }
 0x127   :  { %1442 = vmatmul.mubr.msk.f32.gmra.mrb[14].mxu1 %vm212_vm0, %v1415_v57 }
 0x128   :  { %1476 = vmatprep.mubr.f32.mxu1 %v1835_v9 }
 0x1de   :  { %v1422_v2 = vpop.f32.mrb[0].mxu1 }
 0x1df   :  { %v333_v3 = vadd.f32 %v1422_v2, %v1975_v1  ;;  %v327_v4 = vpop.f32.mrb[1].mxu1 }
 0x1e0   :  { %v328_v5 = vadd.f32 %v1975_v1, %v327_v4 }
 0x1e1   :  { %v407_v6 = vmax.f32 %v333_v3, 0.0 }
 0x1e2   :  { %v406_v7 = vmax.f32 %v328_v5, 0.0  ;;  %v1425_v8 = vpop.f32.mrb[2].mxu1 }
 0x1e3   :  { %v343_v10 = vadd.f32 %v1425_v8, %v1975_v1  ;;  %v337_v11 = vpop.f32.mrb[3].mxu1 }
 0x1e4   :  { %v1656_v12 = vpack.c.bf16 %v407_v6, %v406_v7  ;;  %v338_v13 = vadd.f32 %v1975_v1, %v337_v11 }
 0x1e5   :  { %v409_v14 = vmax.f32 %v343_v10, 0.0 }
 0x1e6   :  { %v408_v15 = vmax.f32 %v338_v13, 0.0  ;;  %v1428_v16 = vpop.f32.mrb[4].mxu1  ;;  %1657 = vmatprep.subr.bf16.mxu1 %v1656_v12  ;;  %v788_v13 = vld [vmem:[#allocation2 + $0x40] sm:$0xff] }
 0x1e7   :  { %v353_v17 = vadd.f32 %v1428_v16, %v1975_v1  ;;  %v347_v18 = vpop.f32.mrb[5].mxu1  ;;  %1659 = vmatpush3.bf16.msra.mxu1 %v1656_v12  ;;  %v787_v12 = vld [vmem:[#allocation2 + $0x38] sm:$0xff] }
 0x1e8   :  { %v1660_v19 = vpack.c.bf16 %v409_v14, %v408_v15  ;;  %v348_v20 = vadd.f32 %v1975_v1, %v347_v18  ;;  %v789_v15 = vld [vmem:[#allocation2 + $0x48] sm:$0xff] }
 0x1e9   :  { %v411_v21 = vmax.f32 %v353_v17, 0.0  ;;  %v1700_v16 = vpack.c.bf16 %v789_v15, %v788_v13 }
 0x1ea   :  { %v410_v22 = vmax.f32 %v348_v20, 0.0  ;;  %v1431_v23 = vpop.f32.mrb[6].mxu1  ;;  %1661 = vmatprep.subr.bf16.mxu1 %v1660_v19 }
 0x1eb   :  { %v363_v24 = vadd.f32 %v1431_v23, %v1975_v1  ;;  %v357_v25 = vpop.f32.mrb[7].mxu1  ;;  %1663 = vmatpush3.bf16.msra.mxu1 %v1660_v19 }
 0x1ec   :  { %v1664_v26 = vpack.c.bf16 %v411_v21, %v410_v22  ;;  %v358_v27 = vadd.f32 %v1975_v1, %v357_v25 }
 0x1ed   :  { %v413_v43 = vmax.f32 %v363_v24, 0.0 }
 0x1ee   :  { %v412_v44 = vmax.f32 %v358_v27, 0.0  ;;  %v1434_v45 = vpop.f32.mrb[8].mxu1  ;;  %1665 = vmatprep.subr.bf16.mxu1 %v1664_v26 }
 0x1ef   :  { %v373_v46 = vadd.f32 %v1434_v45, %v1975_v1  ;;  %v367_v47 = vpop.f32.mrb[9].mxu1  ;;  %1667 = vmatpush3.bf16.msra.mxu1 %v1664_v26 }
 0x1f0   :  { %v1668_v48 = vpack.c.bf16 %v413_v43, %v412_v44  ;;  %v368_v49 = vadd.f32 %v1975_v1, %v367_v47 }
 0x1f1   :  { %v415_v50 = vmax.f32 %v373_v46, 0.0 }
 0x1f2   :  { %v414_v51 = vmax.f32 %v368_v49, 0.0  ;;  %v1437_v52 = vpop.f32.mrb[10].mxu1  ;;  %1669 = vmatprep.subr.bf16.mxu1 %v1668_v48 }
 0x1f3   :  { %v383_v53 = vadd.f32 %v1437_v52, %v1975_v1  ;;  %v377_v54 = vpop.f32.mrb[11].mxu1  ;;  %1671 = vmatpush3.bf16.msra.mxu1 %v1668_v48  ;;  %v1172_v48 = vld [vmem:[#allocation2 + $0x51] ss:$0 sm:$0xff] }
 0x1f4   :  { %v1672_v55 = vpack.c.bf16 %v415_v50, %v414_v51  ;;  %v378_v56 = vadd.f32 %v1975_v1, %v377_v54 }
 0x1f5   :  { %v417_v57 = vmax.f32 %v383_v53, 0.0 }
 0x1f6   :  { %v416_v58 = vmax.f32 %v378_v56, 0.0  ;;  %v1440_v59 = vpop.f32.mrb[12].mxu1  ;;  %1673 = vmatprep.subr.bf16.mxu1 %v1672_v55 }
 0x1f7   :  { %v393_v60 = vadd.f32 %v1440_v59, %v1975_v1  ;;  %v387_v61 = vpop.f32.mrb[13].mxu1  ;;  %1675 = vmatpush3.bf16.msra.mxu1 %v1672_v55 }
 0x1f8   :  { %v1676_v62 = vpack.c.bf16 %v417_v57, %v416_v58  ;;  %v388_v63 = vadd.f32 %v1975_v1, %v387_v61 }
 0x1f9   :  { %v419_v0 = vmax.f32 %v393_v60, 0.0 }
 0x1fa   :  { %v418_v2 = vmax.f32 %v388_v63, 0.0  ;;  %v1443_v3 = vpop.f32.mrb[14].mxu1  ;;  %1677 = vmatprep.subr.bf16.mxu1 %v1676_v62 }
 0x1fb   :  { %v403_v4 = vadd.f32 %v1443_v3, %v1975_v1  ;;  %v397_v5 = vpop.f32.mrb[15].mxu1  ;;  %1679 = vmatpush3.bf16.msra.mxu1 %v1676_v62 }
 0x1fc   :  { %v1680_v6 = vpack.c.bf16 %v419_v0, %v418_v2  ;;  %v398_v7 = vadd.f32 %v1975_v1, %v397_v5  ;;  %v786_v1 = vld [vmem:[#allocation2 + $0x30] sm:$0xff] }
 0x1fd   :  { %v421_v8 = vmax.f32 %v403_v4, 0.0  ;;  %v1696_v14 = vpack.c.bf16 %v787_v12, %v786_v1 }
 0x1fe   :  { %v420_v10 = vmax.f32 %v398_v7, 0.0  ;;  %1681 = vmatprep.subr.bf16.mxu1 %v1680_v6 }
 0x1ff   :  { %1683 = vmatpush3.bf16.msra.mxu1 %v1680_v6 }
 0x200   :  { %v1684_v11 = vpack.c.bf16 %v421_v8, %v420_v10 }
 0x202   :  { %1685 = vmatprep.subr.bf16.mxu1 %v1684_v11 }
 0x203   :  { %1687 = vmatpush3.bf16.msra.mxu1 %v1684_v11 }
 0x204   :  { %1697 = vmatprep.subr.bf16.mxu1 %v1696_v14 }
 0x206   :  { %1477 = vmatmul.mubr.f32.vlgmr.msra.gmra.mrb[16].mxu1 %v1871_v28 }
 0x207   :  { %1479 = vmatprep.mubr.f32.mxu1 %v1876_v29  ;;  %1699 = vmatpush3.bf16.msra.mxu1 %v1696_v14 }
 0x208   :  { %1701 = vmatprep.subr.bf16.mxu1 %v1700_v16 }
 0x20a   :  { %1480 = vmatmul.mubr.f32.gmra.mrb[18].mxu1 %v1883_v30 }
 0x20b   :  { %1482 = vmatprep.mubr.f32.mxu1 %v1888_v31  ;;  %1703 = vmatpush3.bf16.msra.mxu1 %v1700_v16 }
 0x20e   :  { %1483 = vmatmul.mubr.f32.gmra.mrb[20].mxu1 %v1895_v32 }
 0x20f   :  { %1485 = vmatprep.mubr.f32.mxu1 %v1900_v33 }
 0x212   :  { %1486 = vmatmul.mubr.f32.gmra.mrb[22].mxu1 %v1907_v34 }
 0x213   :  { %1488 = vmatprep.mubr.f32.mxu1 %v1912_v35 }
 0x216   :  { %1489 = vmatmul.mubr.f32.gmra.mrb[24].mxu1 %v1919_v36 }
 0x217   :  { %1491 = vmatprep.mubr.f32.mxu1 %v1924_v37 }
 0x21a   :  { %1492 = vmatmul.mubr.f32.gmra.mrb[26].mxu1 %v1931_v38 }
 0x21b   :  { %1494 = vmatprep.mubr.f32.mxu1 %v1936_v39 }
 0x21e   :  { %1495 = vmatmul.mubr.f32.gmra.mrb[28].mxu1 %v1943_v40 }
 0x21f   :  { %1497 = vmatprep.mubr.f32.mxu1 %v1948_v41 }
 0x222   :  { %1498 = vmatmul.mubr.f32.gmra.mrb[30].mxu1 %v1955_v42 }
 0x2d9   :  { %v1478_v17 = vpop.f32.mrb[16].mxu1 }
 0x2da   :  { %v493_v18 = vpop.f32.mrb[17].mxu1 }
 0x2db   :  { %1508 = vmatprep.mubr.msk.f32.mxu0 %vm576_vm1, %v493_v18 }
 0x2dc   :  { %1509 = vmatmul.mubr.msk.f32.vlgmr.msra.gmra.mrb[16].mxu0 %vm576_vm1, %v1478_v17 }
 0x2dd   :  { %v1481_v19 = vpop.f32.mrb[18].mxu1 }
 0x2de   :  { %v503_v20 = vpop.f32.mrb[19].mxu1 }
 0x2df   :  { %1511 = vmatprep.mubr.msk.f32.mxu0 %vm576_vm1, %v503_v20 }
 0x2e0   :  { %1512 = vmatmul.mubr.msk.f32.gmra.mrb[18].mxu0 %vm576_vm1, %v1481_v19 }
 0x2e1   :  { %v1484_v21 = vpop.f32.mrb[20].mxu1 }
 0x2e2   :  { %v513_v22 = vpop.f32.mrb[21].mxu1 }
 0x2e3   :  { %1514 = vmatprep.mubr.msk.f32.mxu0 %vm576_vm1, %v513_v22 }
 0x2e4   :  { %1515 = vmatmul.mubr.msk.f32.gmra.mrb[20].mxu0 %vm576_vm1, %v1484_v21 }
 0x2e5   :  { %v1487_v23 = vpop.f32.mrb[22].mxu1 }
 0x2e6   :  { %v523_v24 = vpop.f32.mrb[23].mxu1 }
 0x2e7   :  { %1517 = vmatprep.mubr.msk.f32.mxu0 %vm576_vm1, %v523_v24 }
 0x2e8   :  { %1518 = vmatmul.mubr.msk.f32.gmra.mrb[22].mxu0 %vm576_vm1, %v1487_v23 }
 0x2e9   :  { %v1490_v25 = vpop.f32.mrb[24].mxu1 }
 0x2ea   :  { %v533_v26 = vpop.f32.mrb[25].mxu1 }
 0x2eb   :  { %1520 = vmatprep.mubr.msk.f32.mxu0 %vm576_vm1, %v533_v26 }
 0x2ec   :  { %1521 = vmatmul.mubr.msk.f32.gmra.mrb[24].mxu0 %vm576_vm1, %v1490_v25 }
 0x2ed   :  { %v1493_v27 = vpop.f32.mrb[26].mxu1 }
 0x2ee   :  { %v543_v43 = vpop.f32.mrb[27].mxu1 }
 0x2ef   :  { %1523 = vmatprep.mubr.msk.f32.mxu0 %vm576_vm1, %v543_v43 }
 0x2f0   :  { %1524 = vmatmul.mubr.msk.f32.gmra.mrb[26].mxu0 %vm576_vm1, %v1493_v27 }
 0x2f1   :  { %v1496_v44 = vpop.f32.mrb[28].mxu1 }
 0x2f2   :  { %v553_v45 = vpop.f32.mrb[29].mxu1 }
 0x2f3   :  { %1526 = vmatprep.mubr.msk.f32.mxu0 %vm576_vm1, %v553_v45 }
 0x2f4   :  { %1527 = vmatmul.mubr.msk.f32.gmra.mrb[28].mxu0 %vm576_vm1, %v1496_v44 }
 0x2f5   :  { %v1499_v46 = vpop.f32.mrb[30].mxu1 }
 0x2f6   :  { %v563_v47 = vpop.f32.mrb[31].mxu1 }
 0x2f7   :  { %1529 = vmatprep.mubr.msk.f32.mxu0 %vm576_vm1, %v563_v47 }
 0x2f8   :  { %1530 = vmatmul.mubr.msk.f32.gmra.mrb[30].mxu0 %vm576_vm1, %v1499_v46 }
 0x2f9   :  { %1596 = vmatprep.mubr.f32.mxu0 %v1835_v9 }
 0x3af   :  { %v1510_v49 = vpop.f32.mrb[16].mxu0 }
 0x3b0   :  { %v697_v50 = vadd.f32 %v1510_v49, %v1172_v48  ;;  %v691_v51 = vpop.f32.mrb[17].mxu0 }
 0x3b1   :  { %v692_v52 = vadd.f32 %v1172_v48, %v691_v51 }
 0x3b2   :  { %v771_v55 = vmax.f32 %v697_v50, 0.0 }
 0x3b3   :  { %v770_v53 = vmax.f32 %v692_v52, 0.0  ;;  %v1513_v54 = vpop.f32.mrb[18].mxu0 }
 0x3b4   :  { %v707_v56 = vadd.f32 %v1513_v54, %v1172_v48  ;;  %v701_v57 = vpop.f32.mrb[19].mxu0 }
 0x3b5   :  { %v702_v58 = vadd.f32 %v1172_v48, %v701_v57  ;;  %1540 = vmatprep.mubr.msk.f32.mxu1 %vm576_vm1, %v770_v53 }
 0x3b6   :  { %1541 = vmatmul.mubr.msk.f32.vlgmr.msra.gmra.mrb[32].mxu1 %vm576_vm1, %v771_v55  ;;  %v773_v61 = vmax.f32 %v707_v56, 0.0 }
 0x3b7   :  { %v772_v59 = vmax.f32 %v702_v58, 0.0  ;;  %v1516_v60 = vpop.f32.mrb[20].mxu0 }
 0x3b8   :  { %v717_v62 = vadd.f32 %v1516_v60, %v1172_v48  ;;  %v711_v9 = vpop.f32.mrb[21].mxu0 }
 0x3b9   :  { %v712_v63 = vadd.f32 %v1172_v48, %v711_v9  ;;  %1543 = vmatprep.mubr.msk.f32.mxu1 %vm576_vm1, %v772_v59 }
 0x3ba   :  { %1544 = vmatmul.mubr.msk.f32.gmra.mrb[34].mxu1 %vm576_vm1, %v773_v61  ;;  %v775_v3 = vmax.f32 %v717_v62, 0.0 }
 0x3bb   :  { %v774_v0 = vmax.f32 %v712_v63, 0.0  ;;  %v1519_v2 = vpop.f32.mrb[22].mxu0 }
 0x3bc   :  { %v727_v4 = vadd.f32 %v1519_v2, %v1172_v48  ;;  %v721_v5 = vpop.f32.mrb[23].mxu0 }
 0x3bd   :  { %v722_v6 = vadd.f32 %v1172_v48, %v721_v5  ;;  %1546 = vmatprep.mubr.msk.f32.mxu1 %vm576_vm1, %v774_v0 }
 0x3be   :  { %1547 = vmatmul.mubr.msk.f32.gmra.mrb[36].mxu1 %vm576_vm1, %v775_v3  ;;  %v777_v10 = vmax.f32 %v727_v4, 0.0 }
 0x3bf   :  { %v776_v7 = vmax.f32 %v722_v6, 0.0  ;;  %v1522_v8 = vpop.f32.mrb[24].mxu0 }
 0x3c0   :  { %v737_v11 = vadd.f32 %v1522_v8, %v1172_v48  ;;  %v731_v1 = vpop.f32.mrb[25].mxu0 }
 0x3c1   :  { %v732_v12 = vadd.f32 %v1172_v48, %v731_v1  ;;  %1549 = vmatprep.mubr.msk.f32.mxu1 %vm576_vm1, %v776_v7 }
 0x3c2   :  { %1550 = vmatmul.mubr.msk.f32.gmra.mrb[38].mxu1 %vm576_vm1, %v777_v10  ;;  %v779_v15 = vmax.f32 %v737_v11, 0.0 }
 0x3c3   :  { %v778_v13 = vmax.f32 %v732_v12, 0.0  ;;  %v1525_v14 = vpop.f32.mrb[26].mxu0 }
 0x3c4   :  { %v747_v16 = vadd.f32 %v1525_v14, %v1172_v48  ;;  %v741_v17 = vpop.f32.mrb[27].mxu0 }
 0x3c5   :  { %v742_v18 = vadd.f32 %v1172_v48, %v741_v17  ;;  %1552 = vmatprep.mubr.msk.f32.mxu1 %vm576_vm1, %v778_v13 }
 0x3c6   :  { %1553 = vmatmul.mubr.msk.f32.gmra.mrb[40].mxu1 %vm576_vm1, %v779_v15  ;;  %v781_v21 = vmax.f32 %v747_v16, 0.0 }
 0x3c7   :  { %v780_v19 = vmax.f32 %v742_v18, 0.0  ;;  %v1528_v20 = vpop.f32.mrb[28].mxu0 }
 0x3c8   :  { %v757_v22 = vadd.f32 %v1528_v20, %v1172_v48  ;;  %v751_v23 = vpop.f32.mrb[29].mxu0 }
 0x3c9   :  { %v752_v24 = vadd.f32 %v1172_v48, %v751_v23  ;;  %1555 = vmatprep.mubr.msk.f32.mxu1 %vm576_vm1, %v780_v19 }
 0x3ca   :  { %1556 = vmatmul.mubr.msk.f32.gmra.mrb[42].mxu1 %vm576_vm1, %v781_v21  ;;  %v783_v27 = vmax.f32 %v757_v22, 0.0 }
 0x3cb   :  { %v782_v25 = vmax.f32 %v752_v24, 0.0  ;;  %v1531_v26 = vpop.f32.mrb[30].mxu0 }
 0x3cc   :  { %v767_v43 = vadd.f32 %v1531_v26, %v1172_v48  ;;  %v761_v44 = vpop.f32.mrb[31].mxu0 }
 0x3cd   :  { %v762_v45 = vadd.f32 %v1172_v48, %v761_v44  ;;  %1558 = vmatprep.mubr.msk.f32.mxu1 %vm576_vm1, %v782_v25 }
 0x3ce   :  { %1559 = vmatmul.mubr.msk.f32.gmra.mrb[44].mxu1 %vm576_vm1, %v783_v27  ;;  %v785_v47 = vmax.f32 %v767_v43, 0.0 }
 0x3cf   :  { %v784_v46 = vmax.f32 %v762_v45, 0.0 }
 0x3d1   :  { %1561 = vmatprep.mubr.msk.f32.mxu1 %vm576_vm1, %v784_v46 }
 0x3d2   :  { %1562 = vmatmul.mubr.msk.f32.gmra.mrb[46].mxu1 %vm576_vm1, %v785_v47 }
 0x3d3   :  { %1611 = vmatprep.mubr.f32.mxu1 %v1924_v37 }
 0x489   :  { %v1542_v49 = vpop.f32.mrb[32].mxu1 }
 0x48a   :  { %v905_v50 = vpop.f32.mrb[33].mxu1 }
 0x48b   :  { %v1704_v51 = vpack.c.bf16 %v1542_v49, %v905_v50 }
 0x48d   :  { %v1545_v52 = vpop.f32.mrb[34].mxu1  ;;  %1705 = vmatprep.subr.bf16.mxu0 %v1704_v51  ;;  %1736 = vmatprep.subr.bf16.mxu1 %v1704_v51 }
 0x48e   :  { %v915_v53 = vpop.f32.mrb[35].mxu1  ;;  %1707 = vmatpush3.bf16.msra.mxu0 %v1704_v51  ;;  %1744 = vmatpush3.bf16.msra.mxu1 %v1704_v51 }
 0x48f   :  { %v1708_v48 = vpack.c.bf16 %v1545_v52, %v915_v53 }
 0x491   :  { %v1548_v54 = vpop.f32.mrb[36].mxu1  ;;  %1709 = vmatprep.subr.bf16.mxu0 %v1708_v48  ;;  %1737 = vmatprep.subr.bf16.mxu1 %v1708_v48 }
 0x492   :  { %v925_v55 = vpop.f32.mrb[37].mxu1  ;;  %1711 = vmatpush3.bf16.msra.mxu0 %v1708_v48  ;;  %1745 = vmatpush3.bf16.msra.mxu1 %v1708_v48 }
 0x493   :  { %v1712_v56 = vpack.c.bf16 %v1548_v54, %v925_v55 }
 0x495   :  { %v1551_v57 = vpop.f32.mrb[38].mxu1  ;;  %1713 = vmatprep.subr.bf16.mxu0 %v1712_v56  ;;  %1738 = vmatprep.subr.bf16.mxu1 %v1712_v56 }
 0x496   :  { %v935_v37 = vpop.f32.mrb[39].mxu1  ;;  %1715 = vmatpush3.bf16.msra.mxu0 %v1712_v56  ;;  %1746 = vmatpush3.bf16.msra.mxu1 %v1712_v56 }
 0x497   :  { %v1716_v58 = vpack.c.bf16 %v1551_v57, %v935_v37 }
 0x499   :  { %v1554_v59 = vpop.f32.mrb[40].mxu1  ;;  %1717 = vmatprep.subr.bf16.mxu0 %v1716_v58  ;;  %1739 = vmatprep.subr.bf16.mxu1 %v1716_v58 }
 0x49a   :  { %v945_v60 = vpop.f32.mrb[41].mxu1  ;;  %1719 = vmatpush3.bf16.msra.mxu0 %v1716_v58  ;;  %1747 = vmatpush3.bf16.msra.mxu1 %v1716_v58 }
 0x49b   :  { %v1720_v61 = vpack.c.bf16 %v1554_v59, %v945_v60 }
 0x49d   :  { %v1557_v62 = vpop.f32.mrb[42].mxu1  ;;  %1721 = vmatprep.subr.bf16.mxu0 %v1720_v61  ;;  %1740 = vmatprep.subr.bf16.mxu1 %v1720_v61 }
 0x49e   :  { %v955_v9 = vpop.f32.mrb[43].mxu1  ;;  %1723 = vmatpush3.bf16.msra.mxu0 %v1720_v61  ;;  %1748 = vmatpush3.bf16.msra.mxu1 %v1720_v61 }
 0x49f   :  { %v1724_v63 = vpack.c.bf16 %v1557_v62, %v955_v9 }
 0x4a1   :  { %v1560_v0 = vpop.f32.mrb[44].mxu1  ;;  %1725 = vmatprep.subr.bf16.mxu0 %v1724_v63  ;;  %1741 = vmatprep.subr.bf16.mxu1 %v1724_v63 }
 0x4a2   :  { %v965_v2 = vpop.f32.mrb[45].mxu1  ;;  %1727 = vmatpush3.bf16.msra.mxu0 %v1724_v63  ;;  %1749 = vmatpush3.bf16.msra.mxu1 %v1724_v63 }
 0x4a3   :  { %v1728_v3 = vpack.c.bf16 %v1560_v0, %v965_v2 }
 0x4a5   :  { %v1563_v4 = vpop.f32.mrb[46].mxu1  ;;  %1729 = vmatprep.subr.bf16.mxu0 %v1728_v3  ;;  %1742 = vmatprep.subr.bf16.mxu1 %v1728_v3 }
 0x4a6   :  { %v975_v5 = vpop.f32.mrb[47].mxu1  ;;  %1731 = vmatpush3.bf16.msra.mxu0 %v1728_v3  ;;  %1750 = vmatpush3.bf16.msra.mxu1 %v1728_v3 }
 0x4a7   :  { %v1732_v6 = vpack.c.bf16 %v1563_v4, %v975_v5 }
 0x4a9   :  { %1733 = vmatprep.subr.bf16.mxu0 %v1732_v6  ;;  %1743 = vmatprep.subr.bf16.mxu1 %v1732_v6 }
 0x4aa   :  { %1735 = vmatpush3.bf16.msra.mxu0 %v1732_v6  ;;  %1751 = vmatpush3.bf16.msra.mxu1 %v1732_v6 }
 0x4ad   :  { %1597 = vmatmul.mubr.f32.vlgmr.msra.gmra.mrb[32].mxu0 %v1871_v28  ;;  %1612 = vmatmul.mubr.f32.vlgmr.msra.gmra.mrb[48].mxu1 %v1931_v38  ;;  %v1205_v28 = vld [vmem:[#allocation2 + $0x52] ss:$0 sm:$0xff] }
 0x4ae   :  { %1599 = vmatprep.mubr.f32.mxu0 %v1876_v29  ;;  %1614 = vmatprep.mubr.f32.mxu1 %v1936_v39 }
 0x4b1   :  { %1600 = vmatmul.mubr.f32.gmra.mrb[34].mxu0 %v1883_v30  ;;  %1615 = vmatmul.mubr.f32.gmra.mrb[50].mxu1 %v1943_v40 }
 0x4b2   :  { %1602 = vmatprep.mubr.f32.mxu0 %v1888_v31  ;;  %1617 = vmatprep.mubr.f32.mxu1 %v1948_v41 }
 0x4b5   :  { %1603 = vmatmul.mubr.f32.gmra.mrb[36].mxu0 %v1895_v32  ;;  %1618 = vmatmul.mubr.f32.gmra.mrb[52].mxu1 %v1955_v42 }
 0x4b6   :  { %1605 = vmatprep.mubr.f32.mxu0 %v1900_v33 }
 0x4b9   :  { %1606 = vmatmul.mubr.f32.gmra.mrb[38].mxu0 %v1907_v34 }
 0x4ba   :  { %1608 = vmatprep.mubr.f32.mxu0 %v1912_v35 }
 0x4bd   :  { %1609 = vmatmul.mubr.f32.gmra.mrb[40].mxu0 %v1919_v36 }
 0x580   :  { %v1598_v29 = vpop.f32.mrb[32].mxu0  ;;  %v1613_v30 = vpop.f32.mrb[48].mxu1 }
 0x581   :  { %v1060_v38 = vadd.f32 %v1598_v29, %v1205_v28  ;;  %v1054_v31 = vpop.f32.mrb[33].mxu0  ;;  %v1110_v39 = vadd.f32 %v1613_v30, %v1205_v28  ;;  %v1104_v40 = vpop.f32.mrb[49].mxu1 }
 0x582   :  { %v1055_v41 = vadd.f32 %v1205_v28, %v1054_v31  ;;  %v1105_v32 = vadd.f32 %v1205_v28, %v1104_v40 }
 0x583   :  { %1135 = vst.msk [vmem:[%s2123_s3 + $0x8] sm:$0xff] %vm1133_vm2, %v1060_v38  ;;  %1145 = vst.msk [vmem:[%s2123_s3 + $0x58] sm:$0xff] %vm1133_vm2, %v1110_v39 }
 0x584   :  { %1134 = vst.msk [vmem:[%s2123_s3] sm:$0xff] %vm1133_vm2, %v1055_v41  ;;  %v1601_v33 = vpop.f32.mrb[34].mxu0  ;;  %1144 = vst.msk [vmem:[%s2123_s3 + $0x50] sm:$0xff] %vm1133_vm2, %v1105_v32  ;;  %v1616_v34 = vpop.f32.mrb[50].mxu1 }
 0x585   :  { %v1070_v35 = vadd.f32 %v1601_v33, %v1205_v28  ;;  %v1064_v36 = vpop.f32.mrb[35].mxu0  ;;  %v1120_v42 = vadd.f32 %v1616_v34, %v1205_v28  ;;  %v1114_v7 = vpop.f32.mrb[51].mxu1 }
 0x586   :  { %v1065_v8 = vadd.f32 %v1205_v28, %v1064_v36  ;;  %v1115_v10 = vadd.f32 %v1205_v28, %v1114_v7 }
 0x587   :  { %1137 = vst.msk [vmem:[%s2123_s3 + $0x18] sm:$0xff] %vm1133_vm2, %v1070_v35  ;;  %1147 = vst.msk [vmem:[%s2123_s3 + $0x68] sm:$0xff] %vm1133_vm2, %v1120_v42 }
 0x588   :  { %1136 = vst.msk [vmem:[%s2123_s3 + $0x10] sm:$0xff] %vm1133_vm2, %v1065_v8  ;;  %v1604_v11 = vpop.f32.mrb[36].mxu0  ;;  %1146 = vst.msk [vmem:[%s2123_s3 + $0x60] sm:$0xff] %vm1133_vm2, %v1115_v10  ;;  %v1619_v1 = vpop.f32.mrb[52].mxu1 }
 0x589   :  { %v1080_v12 = vadd.f32 %v1604_v11, %v1205_v28  ;;  %v1074_v13 = vpop.f32.mrb[37].mxu0  ;;  %v1130_v14 = vadd.f32 %v1619_v1, %v1205_v28  ;;  %v1124_v15 = vpop.f32.mrb[53].mxu1 }
 0x58a   :  { %v1075_v16 = vadd.f32 %v1205_v28, %v1074_v13  ;;  %v1125_v17 = vadd.f32 %v1205_v28, %v1124_v15 }
 0x58b   :  { %1139 = vst.msk [vmem:[%s2123_s3 + $0x28] sm:$0xff] %vm1133_vm2, %v1080_v12  ;;  %1149 = vst.msk [vmem:[%s2123_s3 + $0x78] sm:$0xff] %vm1133_vm2, %v1130_v14 }
 0x58c   :  { %1138 = vst.msk [vmem:[%s2123_s3 + $0x20] sm:$0xff] %vm1133_vm2, %v1075_v16  ;;  %v1607_v18 = vpop.f32.mrb[38].mxu0  ;;  %1148 = vst.msk [vmem:[%s2123_s3 + $0x70] sm:$0xff] %vm1133_vm2, %v1125_v17 }
 0x58d   :  { %v1090_v19 = vadd.f32 %v1607_v18, %v1205_v28  ;;  %v1084_v20 = vpop.f32.mrb[39].mxu0 }
 0x58e   :  { %v1085_v21 = vadd.f32 %v1205_v28, %v1084_v20 }
 0x58f   :  { %1141 = vst.msk [vmem:[%s2123_s3 + $0x38] sm:$0xff] %vm1133_vm2, %v1090_v19 }
 0x590   :  { %1140 = vst.msk [vmem:[%s2123_s3 + $0x30] sm:$0xff] %vm1133_vm2, %v1085_v21  ;;  %v1610_v22 = vpop.f32.mrb[40].mxu0 }
 0x591   :  { %v1100_v23 = vadd.f32 %v1610_v22, %v1205_v28  ;;  %v1094_v24 = vpop.f32.mrb[41].mxu0 }
 0x592   :  { %v1095_v25 = vadd.f32 %v1205_v28, %v1094_v24 }
 0x593   :  { %1143 = vst.msk [vmem:[%s2123_s3 + $0x48] sm:$0xff] %vm1133_vm2, %v1100_v23 }
 0x594   :  { %1142 = vst.msk [vmem:[%s2123_s3 + $0x40] sm:$0xff] %vm1133_vm2, %v1095_v25 }
 0x595   :  { %1154 = vsyncpa [#allocation3], 1 }

</bundles_post_ra>
